<compile_context>
chip_gen: v7x
topology: tpu7x:2x2x1
jax: 0.10.0
libtpu: 0.0.40
codegen_flags: <defaults>
</compile_context>

<pallas_src>
import functools

import jax
import jax.numpy as jnp
import numpy as np
from jax import lax
from jax.experimental import pallas as pl
from jax.experimental.pallas import tpu as pltpu


def _round_up(x, m):
    return ((x + m - 1) // m) * m


# ---------------------------------------------------------------------------
# Fused TCN kernel: all dilated-residual layers + final 1x1 conv.
# One batch element per grid step; activation resident in VMEM scratch.
# ---------------------------------------------------------------------------
def _tcn_fused_kernel(x_ref, m_ref, wd_ref, w1_ref, vp_ref, wo_ref, bo_ref,
                      o_ref, xbuf_ref, *, num_layers, dilation_factor, eps,
                      pad, apply_mask, compute_dtype):
    """
    x_ref   : (1, T, C)        input activation (f32)
    m_ref   : (1, T, 1)        mask column (f32; ones if no mask)
    wd_ref  : (L*3, C, C)      dilated-conv weights, (layer, tap) as (in, out)
    w1_ref  : (L, C, C)        1x1 conv weights (in, out)
    vp_ref  : (L, 4, C)        per-layer vectors [bd, b1, gamma, beta] (f32)
    wo_ref  : (C, Cout)        output conv weight (in, out)
    bo_ref  : (1, Cout)        output conv bias (f32)
    o_ref   : (1, T, Cout)
    xbuf_ref: (T + 2*pad, C)   VMEM-resident activation with zero apron (f32)
    """
    T = o_ref.shape[1]
    P = pad
    m = m_ref[0]                                    # (T, 1), lane-broadcast later

    # Load activation into the resident buffer; the apron rows stay zero and
    # provide the Conv1d zero padding for every layer (no HBM jnp.pad).
    xbuf_ref[...] = jnp.zeros_like(xbuf_ref)
    xbuf_ref[P:P + T, :] = x_ref[0]

    for l in range(num_layers):                     # static unroll over layers
        d = dilation_factor ** l
        x = xbuf_ref[P:P + T, :]                    # sublane-aligned (P % 8 == 0)
        x_prev = xbuf_ref[P - d:P - d + T, :]       # x[t - d]  (zero apron)
        x_next = xbuf_ref[P + d:P + d + T, :]       # x[t + d]  (zero apron)
        vp = vp_ref[l]                              # (4, C)

        # Dilated conv (kernel size 3): bf16 MXU operands, f32 accumulation.
        h = (jnp.dot(x_prev.astype(compute_dtype), wd_ref[3 * l + 0],
                     preferred_element_type=jnp.float32)
             + jnp.dot(x.astype(compute_dtype), wd_ref[3 * l + 1],
                       preferred_element_type=jnp.float32)
             + jnp.dot(x_next.astype(compute_dtype), wd_ref[3 * l + 2],
                       preferred_element_type=jnp.float32)
             + vp[0:1, :])
        h = jnp.maximum(h, 0.0)                     # ReLU

        # 1x1 conv.  TODO(synk): dropout treated as identity (eval mode).
        out = jnp.dot(h.astype(compute_dtype), w1_ref[l],
                      preferred_element_type=jnp.float32) + vp[1:2, :]

        # Residual + mask (mask column broadcast across the lane/channel axis).
        y = x + out
        if apply_mask:
            y = y * m

        # LayerNorm over the channel dim (kept in f32).
        mean = jnp.mean(y, axis=-1, keepdims=True)
        var = jnp.mean(jnp.square(y - mean), axis=-1, keepdims=True)
        y = (y - mean) * lax.rsqrt(var + eps) * vp[2:3, :] + vp[3:4, :]

        xbuf_ref[P:P + T, :] = y                    # stays resident in VMEM

    # Final 1x1 output conv, fused (no extra HBM round trip of the activation).
    xf = xbuf_ref[P:P + T, :]
    o = jnp.dot(xf.astype(compute_dtype), wo_ref[...],
                preferred_element_type=jnp.float32) + bo_ref[...]
    if apply_mask:
        o = o * m
    o_ref[0] = o.astype(o_ref.dtype)


def _conv1x1_kernel(x_ref, w_ref, b_ref, o_ref, *, compute_dtype):
    """Input-projection 1x1 conv (only used when in_map=True; no mask)."""
    y = jnp.dot(x_ref[0].astype(compute_dtype), w_ref[...],
                preferred_element_type=jnp.float32) + b_ref[...]
    o_ref[0] = y.astype(o_ref.dtype)


# ---------------------------------------------------------------------------
# Wrapper / glue
# ---------------------------------------------------------------------------
def _const_spec(shape):
    n = len(shape)
    return pl.BlockSpec(shape, lambda b, _n=n: (0,) * _n)


def _pack_params(params, num_layers, compute_dtype):
    """Hoist all weight layout conversion out of the per-layer hot path."""
    layers = params["layers"]
    C = layers[0]["wd"].shape[0]
    # PyTorch Conv1d weight (out, in, k) -> per-layer per-tap (in, out), stacked.
    wd = jnp.stack([jnp.transpose(p["wd"], (2, 1, 0)) for p in layers])
    wd = wd.reshape(num_layers * 3, C, C).astype(compute_dtype)        # (L*3, C, C)
    w1 = jnp.stack([jnp.transpose(p["w1"][:, :, 0]) for p in layers]
                   ).astype(compute_dtype)                             # (L, C, C)
    vp = jnp.stack([jnp.stack([p["bd"], p["b1"], p["gamma"], p["beta"]])
                    for p in layers]).astype(jnp.float32)              # (L, 4, C)
    wo = jnp.transpose(params["w_out"][:, :, 0]).astype(compute_dtype)  # (C, Cout)
    bo = params["b_out"].reshape(1, -1).astype(jnp.float32)             # (1, Cout)
    return wd, w1, vp, wo, bo


def tcn_forward(x_bct, params, mask_b1t=None, *, dilation_factor=2, eps=1e-5,
                in_map=False, compute_dtype=jnp.bfloat16):
    """x_bct: (B, C, T) like the PyTorch module; returns (B, out_dim, T)."""
    B, _, T = x_bct.shape
    num_layers = len(params["layers"])
    x = jnp.transpose(x_bct, (0, 2, 1)).astype(jnp.float32)             # (B, T, Cin)

    if mask_b1t is None:
        mask_col = jnp.ones((B, T, 1), jnp.float32)
        apply_mask = False
    else:
        mask_col = jnp.transpose(mask_b1t[:, 0:1, :], (0, 2, 1)).astype(jnp.float32)
        apply_mask = True

    if in_map:
        w_in = jnp.transpose(params["w_in"][:, :, 0]).astype(compute_dtype)
        b_in = params["b_in"].reshape(1, -1).astype(jnp.float32)
        Cin, Chid = w_in.shape
        x = pl.pallas_call(
            functools.partial(_conv1x1_kernel, compute_dtype=compute_dtype),
            out_shape=jax.ShapeDtypeStruct((B, T, Chid), jnp.float32),
            grid=(B,),
            in_specs=[pl.BlockSpec((1, T, Cin), lambda b: (b, 0, 0)),
                      _const_spec((Cin, Chid)),
                      _const_spec((1, Chid))],
            out_specs=pl.BlockSpec((1, T, Chid), lambda b: (b, 0, 0)),
            compiler_params=pltpu.CompilerParams(
                dimension_semantics=("parallel",)),
        )(x, w_in, b_in)

    C = x.shape[-1]
    Cout = params["w_out"].shape[0]
    wd, w1, vp, wo, bo = _pack_params(params, num_layers, compute_dtype)

    max_d = dilation_factor ** (num_layers - 1)
    pad = max(8, _round_up(max_d, 8))   # sublane-aligned zero apron >= max dilation

    kernel = functools.partial(
        _tcn_fused_kernel, num_layers=num_layers,
        dilation_factor=dilation_factor, eps=eps, pad=pad,
        apply_mask=apply_mask, compute_dtype=compute_dtype)

    wsize = jnp.dtype(compute_dtype).itemsize
    cost = pl.CostEstimate(
        flops=int(B * (num_layers * 8 * T * C * C + 2 * T * C * Cout)),
        transcendentals=int(B * num_layers * T),
        bytes_accessed=int(4 * (x.size + mask_col.size + vp.size + bo.size
                                + B * T * Cout)
                           + wsize * (wd.size + w1.size + wo.size)))

    # NOTE: the whole (T, C) activation (+ apron) lives in VMEM scratch; for
    # very long sequences on v7x (64 MiB VMEM) raise vmem_limit_bytes or split T.
    y = pl.pallas_call(
        kernel,
        out_shape=jax.ShapeDtypeStruct((B, T, Cout), jnp.float32),
        grid=(B,),
        in_specs=[
            pl.BlockSpec((1, T, C), lambda b: (b, 0, 0)),     # x
            pl.BlockSpec((1, T, 1), lambda b: (b, 0, 0)),     # mask column
            _const_spec((num_layers * 3, C, C)),              # dilated weights
            _const_spec((num_layers, C, C)),                  # 1x1 weights
            _const_spec((num_layers, 4, C)),                  # bd/b1/gamma/beta
            _const_spec((C, Cout)),                           # output weight
            _const_spec((1, Cout)),                           # output bias
        ],
        out_specs=pl.BlockSpec((1, T, Cout), lambda b: (b, 0, 0)),
        scratch_shapes=[pltpu.VMEM((T + 2 * pad, C), jnp.float32)],
        compiler_params=pltpu.CompilerParams(
            dimension_semantics=("parallel",)),
        cost_estimate=cost,
    )(x, mask_col, wd, w1, vp, wo, bo)

    return jnp.transpose(y, (0, 2, 1))                        # (B, out_dim, T)


# ---------------------------------------------------------------------------
# Deterministic parameter init (PyTorch weight layouts: Conv1d -> (O, I, K))
# ---------------------------------------------------------------------------
def init_tcn_params(key, in_dim, hid_dim, out_dim, num_layers, in_map=False):
    scale = 0.1
    params = {"layers": []}

    def nxt():
        nonlocal key
        key, sub = jax.random.split(key)
        return sub

    if in_map:
        params["w_in"] = jax.random.normal(nxt(), (hid_dim, in_dim, 1), jnp.float32) * scale
        params["b_in"] = jax.random.normal(nxt(), (hid_dim,), jnp.float32) * scale
    else:
        assert in_dim == hid_dim
    for _ in range(num_layers):
        params["layers"].append({
            "wd": jax.random.normal(nxt(), (hid_dim, hid_dim, 3), jnp.float32) * scale,
            "bd": jax.random.normal(nxt(), (hid_dim,), jnp.float32) * scale,
            "w1": jax.random.normal(nxt(), (hid_dim, hid_dim, 1), jnp.float32) * scale,
            "b1": jax.random.normal(nxt(), (hid_dim,), jnp.float32) * scale,
            "gamma": jnp.ones((hid_dim,), jnp.float32),
            "beta": jnp.zeros((hid_dim,), jnp.float32),
        })
    params["w_out"] = jax.random.normal(nxt(), (out_dim, hid_dim, 1), jnp.float32) * scale
    params["b_out"] = jax.random.normal(nxt(), (out_dim,), jnp.float32) * scale
    return params


# ---------------------------------------------------------------------------
# Pure-JAX reference (mirrors the PyTorch forward, eval-mode dropout)
# ---------------------------------------------------------------------------
def ref_tcn(x_bct, params, mask_b1t, dilation_factor, eps, in_map=False):
    dn = ("NCH", "OIH", "NCH")
    x = x_bct.astype(jnp.float32)
    m = None if mask_b1t is None else mask_b1t[:, 0:1, :]
    if in_map:
        x = lax.conv_general_dilated(x, params["w_in"], (1,), [(0, 0)],
                                     dimension_numbers=dn) + params["b_in"][None, :, None]
    for i, p in enumerate(params["layers"]):
        d = dilation_factor ** i
        out = lax.conv_general_dilated(x, p["wd"], (1,), [(d, d)],
                                       rhs_dilation=(d,), dimension_numbers=dn)
        out = jnp.maximum(out + p["bd"][None, :, None], 0.0)
        out = lax.conv_general_dilated(out, p["w1"], (1,), [(0, 0)],
                                       dimension_numbers=dn) + p["b1"][None, :, None]
        x = x + out
        if m is not None:
            x = x * m
        xt = jnp.transpose(x, (0, 2, 1))
        mean = xt.mean(-1, keepdims=True)
        var = jnp.square(xt - mean).mean(-1, keepdims=True)
        xt = (xt - mean) / jnp.sqrt(var + eps) * p["gamma"] + p["beta"]
        x = jnp.transpose(xt, (0, 2, 1))
    out = lax.conv_general_dilated(x, params["w_out"], (1,), [(0, 0)],
                                   dimension_numbers=dn) + params["b_out"][None, :, None]
    if m is not None:
        out = out * m
    return out


if __name__ == "__main__":
    B, C, out_dim, T = 2, 32, 16, 16
    num_layers, dilation_factor, eps = 3, 2, 1e-5

    key = jax.random.PRNGKey(0)
    key, kx = jax.random.split(key)
    x = jax.random.normal(kx, (B, C, T), jnp.float32)
    lengths = jnp.array([16, 11])
    mask = (jnp.arange(T)[None, :] < lengths[:, None]).astype(jnp.float32)[:, None, :]  # (B,1,T)

    params = init_tcn_params(key, C, C, out_dim, num_layers, in_map=False)
    y_ref = ref_tcn(x, params, mask, dilation_factor, eps, in_map=False)

    # Exact path (f32 MXU operands): tight check against the reference.
    y32 = tcn_forward(x, params, mask, dilation_factor=dilation_factor, eps=eps,
                      in_map=False, compute_dtype=jnp.float32)
    y32 = jax.block_until_ready(y32)
    np.testing.assert_allclose(np.asarray(y32), np.asarray(y_ref), rtol=2e-4, atol=2e-4)

    # Fast path (bf16 MXU operands, f32 accumulation + f32 LayerNorm).
    ybf = tcn_forward(x, params, mask, dilation_factor=dilation_factor, eps=eps,
                      in_map=False, compute_dtype=jnp.bfloat16)
    ybf = jax.block_until_ready(ybf)
    np.testing.assert_allclose(np.asarray(ybf), np.asarray(y_ref), rtol=5e-2, atol=5e-2)

    # in_map path (input projection 1x1 conv), no mask.
    in_dim2 = 48
    key, k2 = jax.random.split(key)
    x2 = jax.random.normal(k2, (B, in_dim2, T), jnp.float32)
    params2 = init_tcn_params(key, in_dim2, C, out_dim, 2, in_map=True)
    y2 = tcn_forward(x2, params2, None, dilation_factor=dilation_factor, eps=eps,
                     in_map=True, compute_dtype=jnp.float32)
    y2 = jax.block_until_ready(y2)
    y2_ref = ref_tcn(x2, params2, None, dilation_factor, eps, in_map=True)
    np.testing.assert_allclose(np.asarray(y2), np.asarray(y2_ref), rtol=2e-4, atol=2e-4)

    print("KERNEL_OK")
</pallas_src>

<mosaic_0001>
module attributes {stable_mosaic.version = 11 : i64} {
  func.func @_tcn_fused_kernel(%arg0: i32, %arg1: memref<1x16x32xf32, #tpu.memory_space<vmem>>, %arg2: memref<1x16x1xf32, #tpu.memory_space<vmem>>, %arg3: memref<9x32x32xf32, #tpu.memory_space<vmem>>, %arg4: memref<3x32x32xf32, #tpu.memory_space<vmem>>, %arg5: memref<3x4x32xf32, #tpu.memory_space<vmem>>, %arg6: memref<32x16xf32, #tpu.memory_space<vmem>>, %arg7: memref<1x16xf32, #tpu.memory_space<vmem>>, %arg8: memref<1x16x16xf32, #tpu.memory_space<vmem>>, %arg9: memref<32x32xf32, #tpu.memory_space<vmem>>) attributes {dimension_semantics = [#tpu.dimension_semantics<parallel>], iteration_bounds = array<i64: 2>, scalar_prefetch = 0 : i64, scratch_operands = 1 : i64, tpu.core_type = #tpu.core_type<tc>, window_params = [{transform_indices = @transform_0, window_bounds = array<i64: 1, 16, 32>}, {transform_indices = @transform_1, window_bounds = array<i64: 1, 16, 1>}, {pipeline_mode = #tpu.pipeline_mode<synchronous>, transform_indices = @transform_2, window_bounds = array<i64: 9, 32, 32>}, {pipeline_mode = #tpu.pipeline_mode<synchronous>, transform_indices = @transform_3, window_bounds = array<i64: 3, 32, 32>}, {pipeline_mode = #tpu.pipeline_mode<synchronous>, transform_indices = @transform_4, window_bounds = array<i64: 3, 4, 32>}, {pipeline_mode = #tpu.pipeline_mode<synchronous>, transform_indices = @transform_5, window_bounds = array<i64: 32, 16>}, {pipeline_mode = #tpu.pipeline_mode<synchronous>, transform_indices = @transform_6, window_bounds = array<i64: 1, 16>}, {transform_indices = @transform_7, window_bounds = array<i64: 1, 16, 16>}]} {
    %c0 = arith.constant 0 : index
    %c0_0 = arith.constant 0 : index
    %c0_1 = arith.constant 0 : index
    %0 = vector.load %arg2[%c0, %c0_0, %c0_1] : memref<1x16x1xf32, #tpu.memory_space<vmem>>, vector<1x16x1xf32>
    %1 = vector.shape_cast %0 : vector<1x16x1xf32> to vector<16x1xf32>
    %cst = arith.constant 0.000000e+00 : f32
    %2 = vector.broadcast %cst : f32 to vector<32x32xf32>
    %c0_2 = arith.constant 0 : index
    %c0_3 = arith.constant 0 : index
    %3 = vector.load %arg9[%c0_2, %c0_3] : memref<32x32xf32, #tpu.memory_space<vmem>>, vector<32x32xf32>
    tpu.vector_store %arg9[%c0_2, %c0_3], %2 {strides = array<i32>} : memref<32x32xf32, #tpu.memory_space<vmem>>, vector<32x32xf32>,
    %c0_4 = arith.constant 0 : index
    %c0_5 = arith.constant 0 : index
    %c0_6 = arith.constant 0 : index
    %4 = vector.load %arg1[%c0_4, %c0_5, %c0_6] : memref<1x16x32xf32, #tpu.memory_space<vmem>>, vector<1x16x32xf32>
    %5 = vector.shape_cast %4 : vector<1x16x32xf32> to vector<16x32xf32>
    %c8 = arith.constant 8 : index
    %c0_7 = arith.constant 0 : index
    %6 = vector.load %arg9[%c8, %c0_7] : memref<32x32xf32, #tpu.memory_space<vmem>>, vector<16x32xf32>
    tpu.vector_store %arg9[%c8, %c0_7], %5 {strides = array<i32>} : memref<32x32xf32, #tpu.memory_space<vmem>>, vector<16x32xf32>,
    %c8_8 = arith.constant 8 : index
    %c0_9 = arith.constant 0 : index
    %7 = vector.load %arg9[%c8_8, %c0_9] : memref<32x32xf32, #tpu.memory_space<vmem>>, vector<16x32xf32>
    %c7 = arith.constant 7 : index
    %c0_10 = arith.constant 0 : index
    %8 = vector.load %arg9[%c7, %c0_10] : memref<32x32xf32, #tpu.memory_space<vmem>>, vector<16x32xf32>
    %c9 = arith.constant 9 : index
    %c0_11 = arith.constant 0 : index
    %9 = vector.load %arg9[%c9, %c0_11] : memref<32x32xf32, #tpu.memory_space<vmem>>, vector<16x32xf32>
    %c0_12 = arith.constant 0 : index
    %c0_13 = arith.constant 0 : index
    %c0_14 = arith.constant 0 : index
    %10 = vector.load %arg5[%c0_12, %c0_13, %c0_14] : memref<3x4x32xf32, #tpu.memory_space<vmem>>, vector<1x4x32xf32>
    %11 = vector.shape_cast %10 : vector<1x4x32xf32> to vector<4x32xf32>
    %c0_15 = arith.constant 0 : index
    %c0_16 = arith.constant 0 : index
    %c0_17 = arith.constant 0 : index
    %12 = vector.load %arg3[%c0_15, %c0_16, %c0_17] : memref<9x32x32xf32, #tpu.memory_space<vmem>>, vector<1x32x32xf32>
    %13 = vector.shape_cast %12 : vector<1x32x32xf32> to vector<32x32xf32>
    %cst_18 = arith.constant dense<0.000000e+00> : vector<16x32xf32>
    %14 = tpu.matmul %8, %13, %cst_18 {dimension_numbers = #tpu.dot_dimension_numbers<[1], [0], [0], [1], [0, 0, 1, 1], [], []>} : vector<16x32xf32>, vector<32x32xf32>, vector<16x32xf32> -> vector<16x32xf32>
    %c1 = arith.constant 1 : index
    %c0_19 = arith.constant 0 : index
    %c0_20 = arith.constant 0 : index
    %15 = vector.load %arg3[%c1, %c0_19, %c0_20] : memref<9x32x32xf32, #tpu.memory_space<vmem>>, vector<1x32x32xf32>
    %16 = vector.shape_cast %15 : vector<1x32x32xf32> to vector<32x32xf32>
    %cst_21 = arith.constant dense<0.000000e+00> : vector<16x32xf32>
    %17 = tpu.matmul %7, %16, %cst_21 {dimension_numbers = #tpu.dot_dimension_numbers<[1], [0], [0], [1], [0, 0, 1, 1], [], []>} : vector<16x32xf32>, vector<32x32xf32>, vector<16x32xf32> -> vector<16x32xf32>
    %18 = arith.addf %14, %17 : vector<16x32xf32>
    %c2 = arith.constant 2 : index
    %c0_22 = arith.constant 0 : index
    %c0_23 = arith.constant 0 : index
    %19 = vector.load %arg3[%c2, %c0_22, %c0_23] : memref<9x32x32xf32, #tpu.memory_space<vmem>>, vector<1x32x32xf32>
    %20 = vector.shape_cast %19 : vector<1x32x32xf32> to vector<32x32xf32>
    %cst_24 = arith.constant dense<0.000000e+00> : vector<16x32xf32>
    %21 = tpu.matmul %9, %20, %cst_24 {dimension_numbers = #tpu.dot_dimension_numbers<[1], [0], [0], [1], [0, 0, 1, 1], [], []>} : vector<16x32xf32>, vector<32x32xf32>, vector<16x32xf32> -> vector<16x32xf32>
    %22 = arith.addf %18, %21 : vector<16x32xf32>
    %23 = vector.extract_strided_slice %11 {offsets = [0, 0], sizes = [1, 32], strides = [1, 1]} : vector<4x32xf32> to vector<1x32xf32>
    %24 = vector.broadcast %23 : vector<1x32xf32> to vector<16x32xf32>
    %25 = arith.addf %22, %24 : vector<16x32xf32>
    %cst_25 = arith.constant 0.000000e+00 : f32
    %26 = vector.broadcast %cst_25 : f32 to vector<16x32xf32>
    %27 = arith.maximumf %25, %26 : vector<16x32xf32>
    %c0_26 = arith.constant 0 : index
    %c0_27 = arith.constant 0 : index
    %c0_28 = arith.constant 0 : index
    %28 = vector.load %arg4[%c0_26, %c0_27, %c0_28] : memref<3x32x32xf32, #tpu.memory_space<vmem>>, vector<1x32x32xf32>
    %29 = vector.shape_cast %28 : vector<1x32x32xf32> to vector<32x32xf32>
    %cst_29 = arith.constant dense<0.000000e+00> : vector<16x32xf32>
    %30 = tpu.matmul %27, %29, %cst_29 {dimension_numbers = #tpu.dot_dimension_numbers<[1], [0], [0], [1], [0, 0, 1, 1], [], []>} : vector<16x32xf32>, vector<32x32xf32>, vector<16x32xf32> -> vector<16x32xf32>
    %31 = vector.extract_strided_slice %11 {offsets = [1, 0], sizes = [1, 32], strides = [1, 1]} : vector<4x32xf32> to vector<1x32xf32>
    %32 = vector.broadcast %31 : vector<1x32xf32> to vector<16x32xf32>
    %33 = arith.addf %30, %32 : vector<16x32xf32>
    %34 = arith.addf %7, %33 : vector<16x32xf32>
    %35 = vector.broadcast %1 : vector<16x1xf32> to vector<16x32xf32>
    %36 = arith.mulf %34, %35 : vector<16x32xf32>
    %cst_30 = arith.constant dense<0.000000e+00> : vector<16xf32>
    %37 = vector.multi_reduction <add>, %36, %cst_30 [1] : vector<16x32xf32> to vector<16xf32>
    %38 = vector.shape_cast %37 : vector<16xf32> to vector<16x1xf32>
    %cst_31 = arith.constant 3.200000e+01 : f32
    %39 = vector.broadcast %cst_31 : f32 to vector<16x1xf32>
    %40 = arith.divf %38, %39 : vector<16x1xf32>
    %41 = vector.broadcast %40 : vector<16x1xf32> to vector<16x32xf32>
    %42 = arith.subf %36, %41 : vector<16x32xf32>
    %43 = arith.mulf %42, %42 : vector<16x32xf32>
    %cst_32 = arith.constant dense<0.000000e+00> : vector<16xf32>
    %44 = vector.multi_reduction <add>, %43, %cst_32 [1] : vector<16x32xf32> to vector<16xf32>
    %45 = vector.shape_cast %44 : vector<16xf32> to vector<16x1xf32>
    %cst_33 = arith.constant 3.200000e+01 : f32
    %46 = vector.broadcast %cst_33 : f32 to vector<16x1xf32>
    %47 = arith.divf %45, %46 : vector<16x1xf32>
    %48 = vector.broadcast %40 : vector<16x1xf32> to vector<16x32xf32>
    %49 = arith.subf %36, %48 : vector<16x32xf32>
    %cst_34 = arith.constant 9.99999974E-6 : f32
    %50 = vector.broadcast %cst_34 : f32 to vector<16x1xf32>
    %51 = arith.addf %47, %50 : vector<16x1xf32>
    %52 = math.rsqrt %51 : vector<16x1xf32>
    %53 = vector.broadcast %52 : vector<16x1xf32> to vector<16x32xf32>
    %54 = arith.mulf %49, %53 : vector<16x32xf32>
    %55 = vector.extract_strided_slice %11 {offsets = [2, 0], sizes = [1, 32], strides = [1, 1]} : vector<4x32xf32> to vector<1x32xf32>
    %56 = vector.broadcast %55 : vector<1x32xf32> to vector<16x32xf32>
    %57 = arith.mulf %54, %56 : vector<16x32xf32>
    %58 = vector.extract_strided_slice %11 {offsets = [3, 0], sizes = [1, 32], strides = [1, 1]} : vector<4x32xf32> to vector<1x32xf32>
    %59 = vector.broadcast %58 : vector<1x32xf32> to vector<16x32xf32>
    %60 = arith.addf %57, %59 : vector<16x32xf32>
    %c8_35 = arith.constant 8 : index
    %c0_36 = arith.constant 0 : index
    %61 = vector.load %arg9[%c8_35, %c0_36] : memref<32x32xf32, #tpu.memory_space<vmem>>, vector<16x32xf32>
    tpu.vector_store %arg9[%c8_35, %c0_36], %60 {strides = array<i32>} : memref<32x32xf32, #tpu.memory_space<vmem>>, vector<16x32xf32>,
    %c8_37 = arith.constant 8 : index
    %c0_38 = arith.constant 0 : index
    %62 = vector.load %arg9[%c8_37, %c0_38] : memref<32x32xf32, #tpu.memory_space<vmem>>, vector<16x32xf32>
    %c6 = arith.constant 6 : index
    %c0_39 = arith.constant 0 : index
    %63 = vector.load %arg9[%c6, %c0_39] : memref<32x32xf32, #tpu.memory_space<vmem>>, vector<16x32xf32>
    %c10 = arith.constant 10 : index
    %c0_40 = arith.constant 0 : index
    %64 = vector.load %arg9[%c10, %c0_40] : memref<32x32xf32, #tpu.memory_space<vmem>>, vector<16x32xf32>
    %c1_41 = arith.constant 1 : index
    %c0_42 = arith.constant 0 : index
    %c0_43 = arith.constant 0 : index
    %65 = vector.load %arg5[%c1_41, %c0_42, %c0_43] : memref<3x4x32xf32, #tpu.memory_space<vmem>>, vector<1x4x32xf32>
    %66 = vector.shape_cast %65 : vector<1x4x32xf32> to vector<4x32xf32>
    %c3 = arith.constant 3 : index
    %c0_44 = arith.constant 0 : index
    %c0_45 = arith.constant 0 : index
    %67 = vector.load %arg3[%c3, %c0_44, %c0_45] : memref<9x32x32xf32, #tpu.memory_space<vmem>>, vector<1x32x32xf32>
    %68 = vector.shape_cast %67 : vector<1x32x32xf32> to vector<32x32xf32>
    %cst_46 = arith.constant dense<0.000000e+00> : vector<16x32xf32>
    %69 = tpu.matmul %63, %68, %cst_46 {dimension_numbers = #tpu.dot_dimension_numbers<[1], [0], [0], [1], [0, 0, 1, 1], [], []>} : vector<16x32xf32>, vector<32x32xf32>, vector<16x32xf32> -> vector<16x32xf32>
    %c4 = arith.constant 4 : index
    %c0_47 = arith.constant 0 : index
    %c0_48 = arith.constant 0 : index
    %70 = vector.load %arg3[%c4, %c0_47, %c0_48] : memref<9x32x32xf32, #tpu.memory_space<vmem>>, vector<1x32x32xf32>
    %71 = vector.shape_cast %70 : vector<1x32x32xf32> to vector<32x32xf32>
    %cst_49 = arith.constant dense<0.000000e+00> : vector<16x32xf32>
    %72 = tpu.matmul %62, %71, %cst_49 {dimension_numbers = #tpu.dot_dimension_numbers<[1], [0], [0], [1], [0, 0, 1, 1], [], []>} : vector<16x32xf32>, vector<32x32xf32>, vector<16x32xf32> -> vector<16x32xf32>
    %73 = arith.addf %69, %72 : vector<16x32xf32>
    %c5 = arith.constant 5 : index
    %c0_50 = arith.constant 0 : index
    %c0_51 = arith.constant 0 : index
    %74 = vector.load %arg3[%c5, %c0_50, %c0_51] : memref<9x32x32xf32, #tpu.memory_space<vmem>>, vector<1x32x32xf32>
    %75 = vector.shape_cast %74 : vector<1x32x32xf32> to vector<32x32xf32>
    %cst_52 = arith.constant dense<0.000000e+00> : vector<16x32xf32>
    %76 = tpu.matmul %64, %75, %cst_52 {dimension_numbers = #tpu.dot_dimension_numbers<[1], [0], [0], [1], [0, 0, 1, 1], [], []>} : vector<16x32xf32>, vector<32x32xf32>, vector<16x32xf32> -> vector<16x32xf32>
    %77 = arith.addf %73, %76 : vector<16x32xf32>
    %78 = vector.extract_strided_slice %66 {offsets = [0, 0], sizes = [1, 32], strides = [1, 1]} : vector<4x32xf32> to vector<1x32xf32>
    %79 = vector.broadcast %78 : vector<1x32xf32> to vector<16x32xf32>
    %80 = arith.addf %77, %79 : vector<16x32xf32>
    %cst_53 = arith.constant 0.000000e+00 : f32
    %81 = vector.broadcast %cst_53 : f32 to vector<16x32xf32>
    %82 = arith.maximumf %80, %81 : vector<16x32xf32>
    %c1_54 = arith.constant 1 : index
    %c0_55 = arith.constant 0 : index
    %c0_56 = arith.constant 0 : index
    %83 = vector.load %arg4[%c1_54, %c0_55, %c0_56] : memref<3x32x32xf32, #tpu.memory_space<vmem>>, vector<1x32x32xf32>
    %84 = vector.shape_cast %83 : vector<1x32x32xf32> to vector<32x32xf32>
    %cst_57 = arith.constant dense<0.000000e+00> : vector<16x32xf32>
    %85 = tpu.matmul %82, %84, %cst_57 {dimension_numbers = #tpu.dot_dimension_numbers<[1], [0], [0], [1], [0, 0, 1, 1], [], []>} : vector<16x32xf32>, vector<32x32xf32>, vector<16x32xf32> -> vector<16x32xf32>
    %86 = vector.extract_strided_slice %66 {offsets = [1, 0], sizes = [1, 32], strides = [1, 1]} : vector<4x32xf32> to vector<1x32xf32>
    %87 = vector.broadcast %86 : vector<1x32xf32> to vector<16x32xf32>
    %88 = arith.addf %85, %87 : vector<16x32xf32>
    %89 = arith.addf %62, %88 : vector<16x32xf32>
    %90 = vector.broadcast %1 : vector<16x1xf32> to vector<16x32xf32>
    %91 = arith.mulf %89, %90 : vector<16x32xf32>
    %cst_58 = arith.constant dense<0.000000e+00> : vector<16xf32>
    %92 = vector.multi_reduction <add>, %91, %cst_58 [1] : vector<16x32xf32> to vector<16xf32>
    %93 = vector.shape_cast %92 : vector<16xf32> to vector<16x1xf32>
    %cst_59 = arith.constant 3.200000e+01 : f32
    %94 = vector.broadcast %cst_59 : f32 to vector<16x1xf32>
    %95 = arith.divf %93, %94 : vector<16x1xf32>
    %96 = vector.broadcast %95 : vector<16x1xf32> to vector<16x32xf32>
    %97 = arith.subf %91, %96 : vector<16x32xf32>
    %98 = arith.mulf %97, %97 : vector<16x32xf32>
    %cst_60 = arith.constant dense<0.000000e+00> : vector<16xf32>
    %99 = vector.multi_reduction <add>, %98, %cst_60 [1] : vector<16x32xf32> to vector<16xf32>
    %100 = vector.shape_cast %99 : vector<16xf32> to vector<16x1xf32>
    %cst_61 = arith.constant 3.200000e+01 : f32
    %101 = vector.broadcast %cst_61 : f32 to vector<16x1xf32>
    %102 = arith.divf %100, %101 : vector<16x1xf32>
    %103 = vector.broadcast %95 : vector<16x1xf32> to vector<16x32xf32>
    %104 = arith.subf %91, %103 : vector<16x32xf32>
    %cst_62 = arith.constant 9.99999974E-6 : f32
    %105 = vector.broadcast %cst_62 : f32 to vector<16x1xf32>
    %106 = arith.addf %102, %105 : vector<16x1xf32>
    %107 = math.rsqrt %106 : vector<16x1xf32>
    %108 = vector.broadcast %107 : vector<16x1xf32> to vector<16x32xf32>
    %109 = arith.mulf %104, %108 : vector<16x32xf32>
    %110 = vector.extract_strided_slice %66 {offsets = [2, 0], sizes = [1, 32], strides = [1, 1]} : vector<4x32xf32> to vector<1x32xf32>
    %111 = vector.broadcast %110 : vector<1x32xf32> to vector<16x32xf32>
    %112 = arith.mulf %109, %111 : vector<16x32xf32>
    %113 = vector.extract_strided_slice %66 {offsets = [3, 0], sizes = [1, 32], strides = [1, 1]} : vector<4x32xf32> to vector<1x32xf32>
    %114 = vector.broadcast %113 : vector<1x32xf32> to vector<16x32xf32>
    %115 = arith.addf %112, %114 : vector<16x32xf32>
    %c8_63 = arith.constant 8 : index
    %c0_64 = arith.constant 0 : index
    %116 = vector.load %arg9[%c8_63, %c0_64] : memref<32x32xf32, #tpu.memory_space<vmem>>, vector<16x32xf32>
    tpu.vector_store %arg9[%c8_63, %c0_64], %115 {strides = array<i32>} : memref<32x32xf32, #tpu.memory_space<vmem>>, vector<16x32xf32>,
    %c8_65 = arith.constant 8 : index
    %c0_66 = arith.constant 0 : index
    %117 = vector.load %arg9[%c8_65, %c0_66] : memref<32x32xf32, #tpu.memory_space<vmem>>, vector<16x32xf32>
    %c4_67 = arith.constant 4 : index
    %c0_68 = arith.constant 0 : index
    %118 = vector.load %arg9[%c4_67, %c0_68] : memref<32x32xf32, #tpu.memory_space<vmem>>, vector<16x32xf32>
    %c12 = arith.constant 12 : index
    %c0_69 = arith.constant 0 : index
    %119 = vector.load %arg9[%c12, %c0_69] : memref<32x32xf32, #tpu.memory_space<vmem>>, vector<16x32xf32>
    %c2_70 = arith.constant 2 : index
    %c0_71 = arith.constant 0 : index
    %c0_72 = arith.constant 0 : index
    %120 = vector.load %arg5[%c2_70, %c0_71, %c0_72] : memref<3x4x32xf32, #tpu.memory_space<vmem>>, vector<1x4x32xf32>
    %121 = vector.shape_cast %120 : vector<1x4x32xf32> to vector<4x32xf32>
    %c6_73 = arith.constant 6 : index
    %c0_74 = arith.constant 0 : index
    %c0_75 = arith.constant 0 : index
    %122 = vector.load %arg3[%c6_73, %c0_74, %c0_75] : memref<9x32x32xf32, #tpu.memory_space<vmem>>, vector<1x32x32xf32>
    %123 = vector.shape_cast %122 : vector<1x32x32xf32> to vector<32x32xf32>
    %cst_76 = arith.constant dense<0.000000e+00> : vector<16x32xf32>
    %124 = tpu.matmul %118, %123, %cst_76 {dimension_numbers = #tpu.dot_dimension_numbers<[1], [0], [0], [1], [0, 0, 1, 1], [], []>} : vector<16x32xf32>, vector<32x32xf32>, vector<16x32xf32> -> vector<16x32xf32>
    %c7_77 = arith.constant 7 : index
    %c0_78 = arith.constant 0 : index
    %c0_79 = arith.constant 0 : index
    %125 = vector.load %arg3[%c7_77, %c0_78, %c0_79] : memref<9x32x32xf32, #tpu.memory_space<vmem>>, vector<1x32x32xf32>
    %126 = vector.shape_cast %125 : vector<1x32x32xf32> to vector<32x32xf32>
    %cst_80 = arith.constant dense<0.000000e+00> : vector<16x32xf32>
    %127 = tpu.matmul %117, %126, %cst_80 {dimension_numbers = #tpu.dot_dimension_numbers<[1], [0], [0], [1], [0, 0, 1, 1], [], []>} : vector<16x32xf32>, vector<32x32xf32>, vector<16x32xf32> -> vector<16x32xf32>
    %128 = arith.addf %124, %127 : vector<16x32xf32>
    %c8_81 = arith.constant 8 : index
    %c0_82 = arith.constant 0 : index
    %c0_83 = arith.constant 0 : index
    %129 = vector.load %arg3[%c8_81, %c0_82, %c0_83] : memref<9x32x32xf32, #tpu.memory_space<vmem>>, vector<1x32x32xf32>
    %130 = vector.shape_cast %129 : vector<1x32x32xf32> to vector<32x32xf32>
    %cst_84 = arith.constant dense<0.000000e+00> : vector<16x32xf32>
    %131 = tpu.matmul %119, %130, %cst_84 {dimension_numbers = #tpu.dot_dimension_numbers<[1], [0], [0], [1], [0, 0, 1, 1], [], []>} : vector<16x32xf32>, vector<32x32xf32>, vector<16x32xf32> -> vector<16x32xf32>
    %132 = arith.addf %128, %131 : vector<16x32xf32>
    %133 = vector.extract_strided_slice %121 {offsets = [0, 0], sizes = [1, 32], strides = [1, 1]} : vector<4x32xf32> to vector<1x32xf32>
    %134 = vector.broadcast %133 : vector<1x32xf32> to vector<16x32xf32>
    %135 = arith.addf %132, %134 : vector<16x32xf32>
    %cst_85 = arith.constant 0.000000e+00 : f32
    %136 = vector.broadcast %cst_85 : f32 to vector<16x32xf32>
    %137 = arith.maximumf %135, %136 : vector<16x32xf32>
    %c2_86 = arith.constant 2 : index
    %c0_87 = arith.constant 0 : index
    %c0_88 = arith.constant 0 : index
    %138 = vector.load %arg4[%c2_86, %c0_87, %c0_88] : memref<3x32x32xf32, #tpu.memory_space<vmem>>, vector<1x32x32xf32>
    %139 = vector.shape_cast %138 : vector<1x32x32xf32> to vector<32x32xf32>
    %cst_89 = arith.constant dense<0.000000e+00> : vector<16x32xf32>
    %140 = tpu.matmul %137, %139, %cst_89 {dimension_numbers = #tpu.dot_dimension_numbers<[1], [0], [0], [1], [0, 0, 1, 1], [], []>} : vector<16x32xf32>, vector<32x32xf32>, vector<16x32xf32> -> vector<16x32xf32>
    %141 = vector.extract_strided_slice %121 {offsets = [1, 0], sizes = [1, 32], strides = [1, 1]} : vector<4x32xf32> to vector<1x32xf32>
    %142 = vector.broadcast %141 : vector<1x32xf32> to vector<16x32xf32>
    %143 = arith.addf %140, %142 : vector<16x32xf32>
    %144 = arith.addf %117, %143 : vector<16x32xf32>
    %145 = vector.broadcast %1 : vector<16x1xf32> to vector<16x32xf32>
    %146 = arith.mulf %144, %145 : vector<16x32xf32>
    %cst_90 = arith.constant dense<0.000000e+00> : vector<16xf32>
    %147 = vector.multi_reduction <add>, %146, %cst_90 [1] : vector<16x32xf32> to vector<16xf32>
    %148 = vector.shape_cast %147 : vector<16xf32> to vector<16x1xf32>
    %cst_91 = arith.constant 3.200000e+01 : f32
    %149 = vector.broadcast %cst_91 : f32 to vector<16x1xf32>
    %150 = arith.divf %148, %149 : vector<16x1xf32>
    %151 = vector.broadcast %150 : vector<16x1xf32> to vector<16x32xf32>
    %152 = arith.subf %146, %151 : vector<16x32xf32>
    %153 = arith.mulf %152, %152 : vector<16x32xf32>
    %cst_92 = arith.constant dense<0.000000e+00> : vector<16xf32>
    %154 = vector.multi_reduction <add>, %153, %cst_92 [1] : vector<16x32xf32> to vector<16xf32>
    %155 = vector.shape_cast %154 : vector<16xf32> to vector<16x1xf32>
    %cst_93 = arith.constant 3.200000e+01 : f32
    %156 = vector.broadcast %cst_93 : f32 to vector<16x1xf32>
    %157 = arith.divf %155, %156 : vector<16x1xf32>
    %158 = vector.broadcast %150 : vector<16x1xf32> to vector<16x32xf32>
    %159 = arith.subf %146, %158 : vector<16x32xf32>
    %cst_94 = arith.constant 9.99999974E-6 : f32
    %160 = vector.broadcast %cst_94 : f32 to vector<16x1xf32>
    %161 = arith.addf %157, %160 : vector<16x1xf32>
    %162 = math.rsqrt %161 : vector<16x1xf32>
    %163 = vector.broadcast %162 : vector<16x1xf32> to vector<16x32xf32>
    %164 = arith.mulf %159, %163 : vector<16x32xf32>
    %165 = vector.extract_strided_slice %121 {offsets = [2, 0], sizes = [1, 32], strides = [1, 1]} : vector<4x32xf32> to vector<1x32xf32>
    %166 = vector.broadcast %165 : vector<1x32xf32> to vector<16x32xf32>
    %167 = arith.mulf %164, %166 : vector<16x32xf32>
    %168 = vector.extract_strided_slice %121 {offsets = [3, 0], sizes = [1, 32], strides = [1, 1]} : vector<4x32xf32> to vector<1x32xf32>
    %169 = vector.broadcast %168 : vector<1x32xf32> to vector<16x32xf32>
    %170 = arith.addf %167, %169 : vector<16x32xf32>
    %c8_95 = arith.constant 8 : index
    %c0_96 = arith.constant 0 : index
    %171 = vector.load %arg9[%c8_95, %c0_96] : memref<32x32xf32, #tpu.memory_space<vmem>>, vector<16x32xf32>
    tpu.vector_store %arg9[%c8_95, %c0_96], %170 {strides = array<i32>} : memref<32x32xf32, #tpu.memory_space<vmem>>, vector<16x32xf32>,
    %c8_97 = arith.constant 8 : index
    %c0_98 = arith.constant 0 : index
    %172 = vector.load %arg9[%c8_97, %c0_98] : memref<32x32xf32, #tpu.memory_space<vmem>>, vector<16x32xf32>
    %c0_99 = arith.constant 0 : index
    %c0_100 = arith.constant 0 : index
    %173 = vector.load %arg6[%c0_99, %c0_100] : memref<32x16xf32, #tpu.memory_space<vmem>>, vector<32x16xf32>
    %cst_101 = arith.constant dense<0.000000e+00> : vector<16x16xf32>
    %174 = tpu.matmul %172, %173, %cst_101 {dimension_numbers = #tpu.dot_dimension_numbers<[1], [0], [0], [1], [0, 0, 1, 1], [], []>} : vector<16x32xf32>, vector<32x16xf32>, vector<16x16xf32> -> vector<16x16xf32>
    %c0_102 = arith.constant 0 : index
    %c0_103 = arith.constant 0 : index
    %175 = vector.load %arg7[%c0_102, %c0_103] : memref<1x16xf32, #tpu.memory_space<vmem>>, vector<1x16xf32>
    %176 = vector.broadcast %175 : vector<1x16xf32> to vector<16x16xf32>
    %177 = arith.addf %174, %176 : vector<16x16xf32>
    %178 = vector.broadcast %1 : vector<16x1xf32> to vector<16x16xf32>
    %179 = arith.mulf %177, %178 : vector<16x16xf32>
    %c0_104 = arith.constant 0 : index
    %c0_105 = arith.constant 0 : index
    %c0_106 = arith.constant 0 : index
    %180 = vector.load %arg8[%c0_104, %c0_105, %c0_106] : memref<1x16x16xf32, #tpu.memory_space<vmem>>, vector<1x16x16xf32>
    %181 = vector.shape_cast %180 : vector<1x16x16xf32> to vector<16x16xf32>
    %182 = vector.shape_cast %179 : vector<16x16xf32> to vector<1x16x16xf32>
    tpu.vector_store %arg8[%c0_104, %c0_105, %c0_106], %182 {strides = array<i32>} : memref<1x16x16xf32, #tpu.memory_space<vmem>>, vector<1x16x16xf32>,
    return
  }
  func.func @transform_0(%arg0: i32) -> (i32, i32, i32) {
    %c0_i32 = arith.constant 0 : i32
    %c0_i32_0 = arith.constant 0 : i32
    %c0_i32_1 = arith.constant 0 : i32
    return %arg0, %c0_i32, %c0_i32_0 : i32, i32, i32
  }
  func.func @transform_1(%arg0: i32) -> (i32, i32, i32) {
    %c0_i32 = arith.constant 0 : i32
    %c0_i32_0 = arith.constant 0 : i32
    %c0_i32_1 = arith.constant 0 : i32
    return %arg0, %c0_i32, %c0_i32_0 : i32, i32, i32
  }
  func.func @transform_2(%arg0: i32) -> (i32, i32, i32) {
    %c0_i32 = arith.constant 0 : i32
    %c0_i32_0 = arith.constant 0 : i32
    %c0_i32_1 = arith.constant 0 : i32
    %c0_i32_2 = arith.constant 0 : i32
    return %c0_i32, %c0_i32_0, %c0_i32_1 : i32, i32, i32
  }
  func.func @transform_3(%arg0: i32) -> (i32, i32, i32) {
    %c0_i32 = arith.constant 0 : i32
    %c0_i32_0 = arith.constant 0 : i32
    %c0_i32_1 = arith.constant 0 : i32
    %c0_i32_2 = arith.constant 0 : i32
    return %c0_i32, %c0_i32_0, %c0_i32_1 : i32, i32, i32
  }
  func.func @transform_4(%arg0: i32) -> (i32, i32, i32) {
    %c0_i32 = arith.constant 0 : i32
    %c0_i32_0 = arith.constant 0 : i32
    %c0_i32_1 = arith.constant 0 : i32
    %c0_i32_2 = arith.constant 0 : i32
    return %c0_i32, %c0_i32_0, %c0_i32_1 : i32, i32, i32
  }
  func.func @transform_5(%arg0: i32) -> (i32, i32) {
    %c0_i32 = arith.constant 0 : i32
    %c0_i32_0 = arith.constant 0 : i32
    %c0_i32_1 = arith.constant 0 : i32
    return %c0_i32, %c0_i32_0 : i32, i32
  }
  func.func @transform_6(%arg0: i32) -> (i32, i32) {
    %c0_i32 = arith.constant 0 : i32
    %c0_i32_0 = arith.constant 0 : i32
    %c0_i32_1 = arith.constant 0 : i32
    return %c0_i32, %c0_i32_0 : i32, i32
  }
  func.func @transform_7(%arg0: i32) -> (i32, i32, i32) {
    %c0_i32 = arith.constant 0 : i32
    %c0_i32_0 = arith.constant 0 : i32
    %c0_i32_1 = arith.constant 0 : i32
    return %arg0, %c0_i32, %c0_i32_0 : i32, i32, i32
  }
}

</mosaic_0001>

<bundles_post_ra>
// kernel: tpu_custom_call.1
= control target key start
LH: loop header
LB: loop body
LE: loop exit
PB: predicated region body
PF: predicated region fallthrough
CT: control target
= control target key end

     0   :  { %12 = vsyncpa [#allocation4], 0  ;;  %s2733_s0 = inlined_call_operand.vmem [shape: f32[2,16,32], index: 0, kind: input, shape index: {}]   ;;  %s2734_s1 = inlined_call_operand.vmem [shape: f32[2,16,1], index: 1, kind: input, shape index: {}]   ;;  %s2735_s2 = inlined_call_operand.hbm [shape: f32[9,32,32], index: 2, kind: input, shape index: {}]   ;;  %s2736_s3 = inlined_call_operand.hbm [shape: f32[3,32,32], index: 3, kind: input, shape index: {}]   ;;  %s2737_s4 = inlined_call_operand.vmem [shape: f32[3,4,32], index: 4, kind: input, shape index: {}]   ;;  %s2738_s5 = inlined_call_operand.vmem [shape: f32[32,16], index: 5, kind: input, shape index: {}]   ;;  %s2739_s6 = inlined_call_operand.vmem [shape: f32[1,16], index: 6, kind: input, shape index: {}]   ;;  %s2740_s7 = inlined_call_operand.hbm [shape: f32[2,16,16], index: 7, kind: output, shape index: {}]  }
   0x1   :  { %13 = vsyncpa [#allocation7], 0 }
   0x2   :  { %14 = vsyncpa [#allocation5], 0 }
   0x3   :  { %16 = vsyncpa [#allocation5 + $0x1], 0  ;;  %s2424_s24 = smov 0   ;;  %s2426_s25 = smov 0  }
   0x4   :  { %s2428_s26 = smov 0   ;;  %s2430_s27 = smov 0  }
   0x5 LB: > { %s2445_s28 = sadd.s32 4294967295, %s2373_s27   ;;  %s1781_s29 = sadd.s32 4294967294, %s2373_s27   ;;  %s2373_s27 = sphi %s2430_s27, %s2760_s27   ;;  %s2369_s26 = sphi %s2428_s26, %s2759_s26   ;;  %s2365_s25 = sphi %s2426_s25, %s2758_s25   ;;  %s2361_s24 = sphi %s2424_s24, %s2757_s24  }
   0x6   : > { %s2449_s30 = sadd.s32 1, %s2373_s27   ;;  %s186_s8 = sadd.s32 1, %s2369_s26 }
   0x7   : > { %s183_s9 = ssub.s32 %s2373_s27, %s2449_s30  ;;  %p196_p0 = scmp.ne.s32.totalorder %s2369_s26, %s2365_s25 }
   0x8   : > { %p184_p1 = scmp.eq.s32.totalorder %s183_s9, 0  ;;  %p197_p2 = scmp.eq.s32.totalorder %s2445_s28, 1 }
   0x9   : > { %p202_p3 = scmp.ne.s32.totalorder %s2365_s25, %s2361_s24  ;;  %p203_p4 = scmp.eq.s32.totalorder %s1781_s29, 1 }
   0xa   : > { %s2460_s10 = scalar_select %p184_p1, %s2369_s26, %s186_s8  }
   0xb   : > { %p2462_p5 = por %p197_p2, %p196_p0  ;;  %p2466_p6 = por %p203_p4, %p202_p3 }
   0xc   : > { %2744 = sst [smem:[#allocation12_spill]] %s2460_s10  ;;  %p1782_p7 = scmp.ge.s32.totalorder %s2373_s27, 1 }
   0xd   : > { %s2745_s11 = scalar_select %p2462_p5, 1, 0 }
   0xe   : > { %s2746_s12 = scalar_select %p2466_p6, 1, 0 }
   0xf   : > { %p210_p8 = scmp.lt.s32.totalorder %s2373_s27, 3  ;;  %p2741_p9 = scmp.eq.s32.totalorder %s2445_s28, 0 }
  0x10   : > { %s2375_s14 = smov [#allocation3]   ;;  %s2376_s17 = smov [#allocation6]  }
  0x11   : > { %p2473_p10 = pnand %p1782_p7, %p210_p8  ;;  %s222_s15 = sshll.u32 %s2375_s14, 4  ;;  %s223_s15 = int_to_ptr.vmem [resolvable:$true] %s222_s15 }
  0x12   : > { %s235_s18 = sshll.u32 %s2376_s17, 4  ;;  %s2247_s21 = scalar_lea.hbm %s2735_s2, 4608  ;;  %s2485_s18 = int_to_ptr.vmem [resolvable:$true] %s235_s18 }
  0x13   : > { %s2747_s13 = scalar_select %p2473_p10, 1, 0 }
  0x14   : > { %p2178_p11 = pneg %p2473_p10  ;;  %p2248_p13 = scmp.ne.s32.totalorder %s2735_s2, %s2247_s21 }
  0x15   : > { %p2254_p3 = scmp.lt.u32.totalorder %s2247_s21, %s2735_s2 }
  0x16   : > { %p2481_p12 = pnand %p2741_p9, %p2178_p11 }
  0x18   : > { %p2249_p0 = pneg %p2481_p12 }
  0x1a   : > { %p2250_p1 = pnand %p2249_p0, %p2248_p13 }
  0x1c   : > { %p2251_p2 = pneg %p2250_p1 }
  0x1e   : > { %p2256_p4 = pnand %p2254_p3, %p2251_p2 }
  0x20   : > { %2259 = shalt.err (!%p2256_p4)
}
  0x21   : > { %s2260_s9 = scalar_lea.vmem %s223_s15, 4608  ;;  %p2268_p9 = scmp.lt.s32.totalorder %s223_s15, %s223_s15 }
  0x22   : > { %p2261_p7 = scmp.ne.s32.totalorder %s223_s15, %s2260_s9  ;;  %p2269_p6 = scmp.lt.s32.totalorder %s2260_s9, %s2260_s9 }
  0x24   : > { %p2263_p8 = pnand %p2261_p7, %p2249_p0  ;;  %p2270_p5 = por %p2269_p6, %p2268_p9 }
  0x26   : > { %p2264_p11 = pneg %p2263_p8 }
  0x28   : > { %p2271_p10 = pnand %p2270_p5, %p2264_p11 }
  0x2a   : > { %2274 = shalt.err (!%p2271_p10)
}
  0x2b   : > { %s2377_s14 = smov 128   ;;  %s2378_s17 = smov 8  }
  0x2c   : > { %2181 = dma.hbm_to_vmem [thread:$0]  (!%p2481_p12), %s2735_s2, 4608, %s223_s15, [#allocation4], %s2377_s14, %s2377_s14, %s2378_s17  }
  0x2d   : > { %s2275_s23 = scalar_lea.hbm %s2736_s3, 1536 }
  0x2e   : > { %p2276_p13 = scmp.ne.s32.totalorder %s2736_s3, %s2275_s23  ;;  %p2282_p9 = scmp.lt.u32.totalorder %s2275_s23, %s2736_s3 }
  0x30   : > { %p2278_p5 = pnand %p2276_p13, %p2249_p0 }
  0x32   : > { %p2279_p6 = pneg %p2278_p5 }
  0x34   : > { %p2284_p10 = pnand %p2282_p9, %p2279_p6 }
  0x36   : > { %2287 = shalt.err (!%p2284_p10)
}
  0x37   : > { %s2288_s15 = scalar_lea.vmem %s2485_s18, 1536  ;;  %p2296_p4 = scmp.lt.s32.totalorder %s2485_s18, %s2485_s18 }
  0x38   : > { %p2289_p1 = scmp.ne.s32.totalorder %s2485_s18, %s2288_s15  ;;  %p2297_p7 = scmp.lt.s32.totalorder %s2288_s15, %s2288_s15 }
  0x3a   : > { %p2291_p2 = pnand %p2289_p1, %p2249_p0  ;;  %p2298_p8 = por %p2297_p7, %p2296_p4 }
  0x3c   : > { %p2292_p3 = pneg %p2291_p2 }
  0x3e   : > { %p2299_p11 = pnand %p2298_p8, %p2292_p3 }
  0x40   : > { %2302 = shalt.err (!%p2299_p11)
}
  0x41   : > { %2184 = dma.hbm_to_vmem [thread:$0]  (!%p2481_p12), %s2736_s3, 1536, %s2485_s18, [#allocation7], %s2377_s14, %s2377_s14, %s2378_s17  }
  0x42   : > { %p2749_p13 = scmp.ne.s32.totalorder %s2747_s13, 0 }
  0x43   : > { %p2750_p5 = scmp.eq.s32.totalorder (!%p2749_p13), %s2445_s28, 0 }
  0x44   : > { %276 = sbr.rel (%p2749_p13) target bundleno = 2662 (0xa66), region = 48 }
  0x4b   : > { %2348 = dma.done.wait (%p2750_p5), [#allocation4], 4608   ;;  %p2751_p0 = pmov %p2750_p5 }
  0x4d   : > { %2350 = vsyncadd (%p2751_p0), [#allocation4], 4294962688  ;;  %p2752_p6 = pmov %p2751_p0 }
  0x4e   : > { %p2753_p9 = pmov %p2751_p0 }
  0x4f   : > { %2352 = dma.done.wait (%p2752_p6), [#allocation7], 1536  }
  0x50   : > { %2354 = vsyncadd (%p2753_p9), [#allocation7], 4294965760  ;;  %p317_p10 = scmp.lt.s32.totalorder %s2445_s28, 1  ;;  %vm329_vm0 = vcmask 261120   ;;  %v2379_v0 = vmov 0.0   ;;  %v350_v1 = vld [vmem:[#allocation3 + $0x20] sm:$0xff]  ;;  %v604_v36 = vlaneseq }
  0x51   : > { %331 = vst.msk [vmem:[#allocation2 + $0x8] sm:$0xff] %vm329_vm0, %v2379_v0  ;;  %330 = vst.msk [vmem:[#allocation2] sm:$0xff] %vm329_vm0, %v2379_v0  ;;  %v351_v2 = vld [vmem:[#allocation3 + $0x28] sm:$0xff]  ;;  %v352_v3 = vld [vmem:[#allocation3 + $0x30] sm:$0xff]  ;;  %v2380_v33 = vmov 0   ;;  %s1830_s9 = sshll.u32 %s2445_s28, 8 }
  0x52   : > { %332 = vst.msk [vmem:[#allocation2 + $0x10] sm:$0xff] %vm329_vm0, %v2379_v0  ;;  %333 = vst.msk [vmem:[#allocation2 + $0x18] sm:$0xff] %vm329_vm0, %v2379_v0  ;;  %s2550_s13 = scalar_select %p317_p10, %s2445_s28, 1  ;;  %v2052_v4 = vpack.c.bf16 %v351_v2, %v350_v1  ;;  %v353_v5 = vld [vmem:[#allocation3 + $0x38] sm:$0xff]  ;;  %v345_v9 = vld [vmem:[#allocation3] sm:$0xff]  ;;  %2234 = vset.pattern.permute.xlu0 %v2380_v33  ;;  %v2571_v37 = vshrl.u32 %v604_v36, 7 }
  0x53   : > { %v2056_v8 = vpack.c.bf16 %v353_v5, %v352_v3  ;;  %v346_v10 = vld [vmem:[#allocation3 + $0x8] sm:$0xff]  ;;  %v612_v11 = vld [vmem:[#allocation6] sm:$0xff]  ;;  %v347_v14 = vld [vmem:[#allocation3 + $0x10] sm:$0xff]  ;;  %vm1668_vm1 = vcmask 130048   ;;  %p2754_p1 = scmp.ne.s32.totalorder %s2745_s11, 0  ;;  %s2381_s14 = smov [#allocation8]  }
  0x54   : > { %s1828_s16 = sshll.u32 %s2550_s13, 4  ;;  %2053 = vmatprep.subr.bf16.mxu0 %v2052_v4  ;;  %v2060_v12 = vpack.c.bf16 %v346_v10, %v345_v9  ;;  %v613_v13 = vld [vmem:[#allocation6 + $0x8] sm:$0xff]  ;;  %v348_v15 = vld [vmem:[#allocation3 + $0x18] sm:$0xff]  ;;  %v517_v21 = vld [vmem:[#allocation3 + $0x40] sm:$0xff]  ;;  %v2574_v38 = vsub.s32 0, %v2571_v37  ;;  %v2586_v47 = vsub.s32 1, %v2571_v37 }
  0x55   : > { %s321_s17 = scalar_lea.vmem %s2733_s0, %s1828_s16  ;;  %2055 = vmatpush3.bf16.msra.mxu0 %v2052_v4  ;;  %v2076_v16 = vpack.c.bf16 %v613_v13, %v612_v11  ;;  %v2064_v19 = vpack.c.bf16 %v348_v15, %v347_v14  ;;  %v518_v22 = vld [vmem:[#allocation3 + $0x48] sm:$0xff]  ;;  %v519_v24 = vld [vmem:[#allocation3 + $0x50] sm:$0xff]  ;;  %v520_v25 = vld [vmem:[#allocation3 + $0x58] sm:$0xff]  ;;  %s326_s22 = scalar_lea.vmem %s2734_s1, %s1828_s16 }
  0x56   : > { %v334_v6 = vld [vmem:[%s321_s17] sm:$0xff]  ;;  %v335_v7 = vld [vmem:[%s321_s17 + $0x8] sm:$0xff]  ;;  %2057 = vmatprep.subr.bf16.mxu0 %v2056_v8  ;;  %v2068_v23 = vpack.c.bf16 %v518_v22, %v517_v21  ;;  %v2072_v27 = vpack.c.bf16 %v520_v25, %v519_v24  ;;  %v614_v30 = vld [vmem:[#allocation6 + $0x10] sm:$0xff]  ;;  %v2601_v25 = vsub.s32 2, %v2571_v37  ;;  %s2687_s16 = scalar_lea.hbm %s2740_s7, %s1830_s9  ;;  %s2307_s17 = sshll.u32 %s2381_s14, 4  ;;  %s2308_s17 = int_to_ptr.vmem [resolvable:$false] %s2307_s17 }
  0x57   : > { %336 = vst.msk [vmem:[#allocation2 + $0x8] sm:$0xff] %vm329_vm0, %v334_v6  ;;  %337 = vst.msk [vmem:[#allocation2 + $0x10] sm:$0xff] %vm329_vm0, %v335_v7  ;;  %2077 = vmatprep.subr.bf16.mxu1 %v2076_v16  ;;  %v615_v31 = vld [vmem:[#allocation6 + $0x18] sm:$0xff]  ;;  %v327_v34 = vld [vmem:[%s326_s22] sm:$0xff]  ;;  %s2309_s20 = scalar_lea.vmem %s2308_s17, 512 }
  0x58   : > { %2079 = vmatpush3.bf16.msra.mxu1 %v2076_v16  ;;  %v2080_v32 = vpack.c.bf16 %v615_v31, %v614_v30  ;;  %705 = vperm.xlu0 %2234, %v327_v34   ;;  %v328_v35 = vld [vmem:[%s326_s22 + $0x8] sm:$0xff]  ;;  %v2579_v39 = vld [vmem:[%s2737_s4] sm:$0xf]  ;;  %v772_v10 = vld [vmem:[#allocation3 + $0x90] sm:$0xff]  ;;  %s314_s22 = sand.u32 1, %s2365_s25  }
  0x59   : > { %2059 = vmatpush3.bf16.msra.mxu0 %v2056_v8  ;;  %v607_v40 = vrot.slane %v2579_v39, %v2574_v38  ;;  %v619_v48 = vrot.slane %v2579_v39, %v2586_v47  ;;  %v770_v7 = vld [vmem:[#allocation3 + $0x80] sm:$0xff]  ;;  %v771_v8 = vld [vmem:[#allocation3 + $0x88] sm:$0xff]  ;;  %v773_v11 = vld [vmem:[#allocation3 + $0x98] sm:$0xff]  ;;  %s1789_s23 = sshll.u32 %s314_s22, 4  ;;  %s2692_s28 = scalar_lea.sflag [#allocation5], %s314_s22 }
  0x5a   : > { %2061 = vmatprep.subr.bf16.mxu0 %v2060_v12  ;;  %2081 = vmatprep.subr.bf16.mxu1 %v2080_v32  ;;  %v2084_v9 = vpack.c.bf16 %v771_v8, %v770_v7  ;;  %v765_v13 = vld [vmem:[#allocation3 + $0x60] sm:$0xff]  ;;  %v766_v14 = vld [vmem:[#allocation3 + $0x68] sm:$0xff]  ;;  %s316_s15 = scalar_lea.vmem [#allocation8], %s1789_s23 }
  0x5b   : > { %v2092_v15 = vpack.c.bf16 %v766_v14, %v765_v13  ;;  %v1033_v16 = vld [vmem:[#allocation6 + $0x20] sm:$0xff]  ;;  %s1685_s10 = sshll.u32 %s316_s15, 4  ;;  %s2689_s10 = int_to_ptr.vmem [resolvable:$true] %s1685_s10 }
  0x5c   : > { %2083 = vmatpush3.bf16.msra.mxu1 %v2080_v32  ;;  %710 = vperm.xlu0 %2234, %v328_v35   ;;  %s2303_s18 = scalar_lea.vmem %s2689_s10, 256  ;;  %p2310_p4 = scmp.lt.s32.totalorder %s2689_s10, %s2308_s17 }
  0x5d   : > { %2085 = vmatprep.subr.bf16.mxu1 %v2084_v9  ;;  %p2304_p12 = scmp.ne.s32.totalorder %s2689_s10, %s2303_s18  ;;  %p2311_p7 = scmp.lt.s32.totalorder %s2309_s20, %s2303_s18 }
  0x5e   : > { %v338_v17 = vld [vmem:[#allocation2 + $0x8] sm:$0xff]  ;;  %v339_v18 = vld [vmem:[#allocation2 + $0x10] sm:$0xff] }
  0x5f   : > { %v340_v20 = vld [vmem:[#allocation2 + $0x7] sm:$0xff]  ;;  %1917 = vmatprep.mubr.msk.f32.mxu0 %vm329_vm0, %v338_v17  ;;  %v341_v26 = vld [vmem:[#allocation2 + $0xf] sm:$0xff]  ;;  %p2305_p2 = pnand %p2304_p12, %p2754_p1  ;;  %p2312_p8 = por %p2311_p7, %p2310_p4 }
  0x60   : > { %1918 = vmatmul.mubr.msk.f32.vlgmr.msra.gmra.mrb[0].mxu0 %vm329_vm0, %v339_v18  ;;  %v342_v28 = vld [vmem:[#allocation2 + $0x9] sm:$0xff]  ;;  %v343_v29 = vld [vmem:[#allocation2 + $0x11] sm:$0xff] }
  0x61   : > { %2063 = vmatpush3.bf16.msra.mxu0 %v2060_v12  ;;  %1928 = vmatprep.mubr.msk.f32.mxu0 %vm329_vm0, %v340_v20  ;;  %v2088_v12 = vpack.c.bf16 %v773_v11, %v772_v10  ;;  %p2306_p3 = pneg %p2305_p2 }
  0x62   : > { %2065 = vmatprep.subr.bf16.mxu0 %v2064_v19 }
  0x63   : > { %p2313_p11 = pnand %p2312_p8, %p2306_p3 }
  0x65   : > { %2067 = vmatpush3.bf16.msra.mxu0 %v2064_v19 }
  0x66   : > { %2069 = vmatprep.subr.bf16.mxu0 %v2068_v23 }
  0x68   : > { %1929 = vmatmul.mubr.msk.f32.vlgmr.msra.gmra.mrb[0].mxu0 %vm329_vm0, %v341_v26  ;;  %v2604_v26 = vsub.s32 3, %v2571_v37 }
  0x69   : > { %2071 = vmatpush3.bf16.msra.mxu0 %v2068_v23  ;;  %1939 = vmatprep.mubr.msk.f32.mxu0 %vm329_vm0, %v342_v28 }
  0x6a   : > { %2073 = vmatprep.subr.bf16.mxu0 %v2072_v27 }
  0x6d   : > { %2075 = vmatpush3.bf16.msra.mxu0 %v2072_v27  ;;  %v745_v27 = vrot.slane %v2579_v39, %v2601_v25 }
  0x70   : > { %1940 = vmatmul.mubr.msk.f32.vlgmr.msra.gmra.mrb[0].mxu0 %vm329_vm0, %v343_v29  ;;  %v751_v29 = vrot.slane %v2579_v39, %v2604_v26  ;;  %v938_v39 = vld [vmem:[#allocation3 + $0xa8] sm:$0xff] }
  0xd7   : > { %v2590_v49 = vpop.permute.xlu0 %705 }
  0xdb   : > { %v2592_v56 = vpop.permute.xlu0 %710 }
 0x143   : > { %v1941_v41 = vpop.f32.mrb[0].mxu0 }
 0x144   : > { %v609_v42 = vadd.f32 %v1941_v41, %v607_v40  ;;  %v593_v43 = vpop.f32.mrb[1].mxu0  ;;  %v768_v41 = vld [vmem:[#allocation3 + $0x78] sm:$0xff] }
 0x145   : > { %v608_v44 = vadd.f32 %v607_v40, %v593_v43  ;;  %v767_v40 = vld [vmem:[#allocation3 + $0x70] sm:$0xff] }
 0x146   : > { %v611_v46 = vmax.f32 %v609_v42, 0.0  ;;  %v2096_v42 = vpack.c.bf16 %v768_v41, %v767_v40 }
 0x147   : > { %v610_v45 = vmax.f32 %v608_v44, 0.0  ;;  %v937_v44 = vld [vmem:[#allocation3 + $0xa0] sm:$0xff] }
 0x149   : > { %1950 = vmatprep.mubr.msk.f32.mxu1 %vm329_vm0, %v610_v45 }
 0x14a   : > { %1951 = vmatmul.mubr.msk.f32.vlgmr.msra.gmra.mrb[0].mxu1 %vm329_vm0, %v611_v46  ;;  %v2100_v46 = vpack.c.bf16 %v938_v39, %v937_v44 }
 0x14b   : > { %2087 = vmatpush3.bf16.msra.mxu1 %v2084_v9 }
 0x14c   : > { %2089 = vmatprep.subr.bf16.mxu1 %v2088_v12 }
 0x14f   : > { %2091 = vmatpush3.bf16.msra.mxu1 %v2088_v12 }
 0x150   : > { %2093 = vmatprep.subr.bf16.mxu1 %v2092_v15 }
 0x21d   : > { %v1952_v50 = vpop.f32.mrb[0].mxu1 }
 0x21e   : > { %v698_v51 = vadd.f32 %v1952_v50, %v619_v48  ;;  %v692_v52 = vpop.f32.mrb[1].mxu1  ;;  %v940_v50 = vld [vmem:[#allocation3 + $0xb8] sm:$0xff] }
 0x21f   : > { %v693_v53 = vadd.f32 %v692_v52, %v619_v48  ;;  %v939_v48 = vld [vmem:[#allocation3 + $0xb0] sm:$0xff] }
 0x220   : > { %v702_v54 = vadd.f32 %v698_v51, %v339_v18  ;;  %v2104_v51 = vpack.c.bf16 %v940_v50, %v939_v48 }
 0x221   : > { %v701_v55 = vadd.f32 %v693_v53, %v338_v17  ;;  %v1034_v17 = vld [vmem:[#allocation6 + $0x28] sm:$0xff] }
 0x222   : > { %v714_v59 = vmul.f32 %v2592_v56, %v702_v54  ;;  %v2108_v18 = vpack.c.bf16 %v1034_v17, %v1033_v16 }
 0x223   : > { %v713_v57 = vmul.f32 %v2590_v49, %v701_v55  ;;  %v1035_v55 = vld [vmem:[#allocation6 + $0x30] sm:$0xff] }
 0x224   : > { %v718_v60 = vsel %vm329_vm0, %v714_v59, 0.0  ;;  %2109 = vmatprep.subr.bf16.mxu0 %v2108_v18 }
 0x225   : > { %v715_v58 = vsel %vm329_vm0, %v713_v57, 0.0  ;;  %2111 = vmatpush3.bf16.msra.mxu0 %v2108_v18 }
 0x226   : > { %716 = vadd.xlane.f32.xlu1 %v715_v58 }
 0x22a   : > { %719 = vadd.xlane.f32.xlu1 %v718_v60 }
 0x2b3   : > { %v717_v61 = vpop.xlane.xlu1 %716 }
 0x2b4   : > { %v722_v62 = vmul.f32 0.03125, %v717_v61 }
 0x2b6   : > { %v724_v63 = vsub.f32 %v713_v57, %v722_v62  ;;  %v1036_v57 = vld [vmem:[#allocation6 + $0x38] sm:$0xff] }
 0x2b7   : > { %v720_v0 = vpop.xlane.xlu1 %719  ;;  %v2112_v58 = vpack.c.bf16 %v1036_v57, %v1035_v55 }
 0x2b8   : > { %v723_v1 = vmul.f32 0.03125, %v720_v0  ;;  %v726_v2 = vmul.f32 %v724_v63, %v724_v63 }
 0x2b9   : > { %2113 = vmatprep.subr.bf16.mxu0 %v2112_v58 }
 0x2ba   : > { %v725_v3 = vsub.f32 %v714_v59, %v723_v1  ;;  %v728_v4 = vsel %vm329_vm0, %v726_v2, 0.0  ;;  %2115 = vmatpush3.bf16.msra.mxu0 %v2112_v58  ;;  %v2621_v59 = vld [vmem:[%s2737_s4 + $0x4] sm:$0xf] }
 0x2bb   : > { %729 = vadd.xlane.f32.xlu0 %v728_v4  ;;  %v1027_v60 = vrot.slane %v2621_v59, %v2574_v38  ;;  %v1161_v48 = vrot.slane %v2621_v59, %v2604_v26 }
 0x2bc   : > { %v727_v5 = vmul.f32 %v725_v3, %v725_v3 }
 0x2be   : > { %v731_v6 = vsel %vm329_vm0, %v727_v5, 0.0 }
 0x2bf   : > { %732 = vadd.xlane.f32.xlu1 %v731_v6 }
 0x348   : > { %v730_v19 = vpop.xlane.xlu0 %729 }
 0x349   : > { %v734_v20 = vmul.f32 0.03125, %v730_v19 }
 0x34b   : > { %v736_v21 = vadd.f32 1e-05, %v734_v20 }
 0x34c   : > { %v733_v22 = vpop.xlane.xlu1 %732 }
 0x34d   : > { %2235 = vrsqrt.f32 %v736_v21  ;;  %v735_v23 = vmul.f32 0.03125, %v733_v22 }
 0x34f   : > { %v737_v24 = vadd.f32 1e-05, %v735_v23 }
 0x351   : > { %2237 = vrsqrt.f32 %v737_v24  ;;  %v1179_v24 = vld [vmem:[#allocation3 + $0xe0] sm:$0xff] }
 0x357   : > { %v2236_v28 = vpop.eup %2235 }
 0x358   : > { %v740_v30 = vmul.f32 %v2236_v28, %v724_v63 }
 0x35a   : > { %v746_v31 = vmul.f32 %v745_v27, %v740_v30  ;;  %v1182_v30 = vld [vmem:[#allocation3 + $0xf8] sm:$0xff] }
 0x35b   : > { %v2238_v32 = vpop.eup %2237 }
 0x35c   : > { %v752_v33 = vadd.f32 %v751_v29, %v746_v31  ;;  %v741_v34 = vmul.f32 %v2238_v32, %v725_v3  ;;  %v1040_v3 = vrot.slane %v2621_v59, %v2586_v47  ;;  %v1174_v32 = vld [vmem:[#allocation3 + $0xc0] sm:$0xff] }
 0x35e   : > { %754 = vst.msk [vmem:[#allocation2 + $0x8] sm:$0xff] %vm329_vm0, %v752_v33  ;;  %v747_v35 = vmul.f32 %v745_v27, %v741_v34  ;;  %v1180_v27 = vld [vmem:[#allocation3 + $0xe8] sm:$0xff] }
 0x35f   : > { %v2116_v28 = vpack.c.bf16 %v1180_v27, %v1179_v24  ;;  %v1175_v33 = vld [vmem:[#allocation3 + $0xc8] sm:$0xff] }
 0x360   : > { %v753_v36 = vadd.f32 %v751_v29, %v747_v35  ;;  %v1181_v29 = vld [vmem:[#allocation3 + $0xf0] sm:$0xff]  ;;  %v2124_v34 = vpack.c.bf16 %v1175_v33, %v1174_v32  ;;  %v1439_v35 = vld [vmem:[#allocation6 + $0x40] sm:$0xff] }
 0x361   : > { %2117 = vmatprep.subr.bf16.mxu0 %v2116_v28  ;;  %v2120_v31 = vpack.c.bf16 %v1182_v30, %v1181_v29 }
 0x362   : > { %755 = vst.msk [vmem:[#allocation2 + $0x10] sm:$0xff] %vm329_vm0, %v753_v36  ;;  %v1440_v36 = vld [vmem:[#allocation6 + $0x48] sm:$0xff] }
 0x365   : > { %v756_v37 = vld [vmem:[#allocation2 + $0x8] sm:$0xff] }
 0x366   : > { %1961 = vmatprep.mubr.msk.f32.mxu1 %vm329_vm0, %v756_v37  ;;  %v758_v45 = vld [vmem:[#allocation2 + $0x6] sm:$0xff] }
 0x369   : > { %v757_v43 = vld [vmem:[#allocation2 + $0x10] sm:$0xff] }
 0x36a   : > { %1962 = vmatmul.mubr.msk.f32.vlgmr.msra.gmra.mrb[2].mxu1 %vm329_vm0, %v757_v43  ;;  %v759_v52 = vld [vmem:[#allocation2 + $0xe] sm:$0xff] }
 0x36b   : > { %2095 = vmatpush3.bf16.msra.mxu1 %v2092_v15  ;;  %1972 = vmatprep.mubr.msk.f32.mxu1 %vm329_vm0, %v758_v45  ;;  %v760_v53 = vld [vmem:[#allocation2 + $0xa] sm:$0xff]  ;;  %v761_v54 = vld [vmem:[#allocation2 + $0x12] sm:$0xff]  ;;  %v1155_v45 = vrot.slane %v2621_v59, %v2601_v25 }
 0x36c   : > { %2097 = vmatprep.subr.bf16.mxu1 %v2096_v42  ;;  %v1347_v59 = vld [vmem:[#allocation3 + $0x108] sm:$0xff] }
 0x36f   : > { %2099 = vmatpush3.bf16.msra.mxu1 %v2096_v42 }
 0x370   : > { %2101 = vmatprep.subr.bf16.mxu1 %v2100_v46 }
 0x372   : > { %1973 = vmatmul.mubr.msk.f32.vlgmr.msra.gmra.mrb[2].mxu1 %vm329_vm0, %v759_v52 }
 0x373   : > { %2103 = vmatpush3.bf16.msra.mxu1 %v2100_v46  ;;  %1983 = vmatprep.mubr.msk.f32.mxu1 %vm329_vm0, %v760_v53 }
 0x374   : > { %2105 = vmatprep.subr.bf16.mxu1 %v2104_v51 }
 0x377   : > { %2107 = vmatpush3.bf16.msra.mxu1 %v2104_v51 }
 0x37a   : > { %1984 = vmatmul.mubr.msk.f32.vlgmr.msra.gmra.mrb[2].mxu1 %vm329_vm0, %v761_v54 }
 0x44d   : > { %v1985_v61 = vpop.f32.mrb[2].mxu1 }
 0x44e   : > { %v1029_v62 = vadd.f32 %v1985_v61, %v1027_v60  ;;  %v1013_v63 = vpop.f32.mrb[3].mxu1  ;;  %v1177_v61 = vld [vmem:[#allocation3 + $0xd8] sm:$0xff] }
 0x44f   : > { %v1028_v0 = vadd.f32 %v1027_v60, %v1013_v63  ;;  %v1176_v60 = vld [vmem:[#allocation3 + $0xd0] sm:$0xff] }
 0x450   : > { %v1031_v2 = vmax.f32 %v1029_v62, 0.0  ;;  %v2128_v62 = vpack.c.bf16 %v1177_v61, %v1176_v60 }
 0x451   : > { %v1030_v1 = vmax.f32 %v1028_v0, 0.0  ;;  %v1346_v0 = vld [vmem:[#allocation3 + $0x100] sm:$0xff] }
 0x453   : > { %1994 = vmatprep.mubr.msk.f32.mxu0 %vm329_vm0, %v1030_v1 }
 0x454   : > { %1995 = vmatmul.mubr.msk.f32.vlgmr.msra.gmra.mrb[2].mxu0 %vm329_vm0, %v1031_v2  ;;  %v2132_v2 = vpack.c.bf16 %v1347_v59, %v1346_v0 }
 0x455   : > { %2119 = vmatpush3.bf16.msra.mxu0 %v2116_v28 }
 0x456   : > { %2121 = vmatprep.subr.bf16.mxu0 %v2120_v31 }
 0x459   : > { %2123 = vmatpush3.bf16.msra.mxu0 %v2120_v31 }
 0x45a   : > { %2125 = vmatprep.subr.bf16.mxu0 %v2124_v34 }
 0x527   : > { %v1996_v4 = vpop.f32.mrb[2].mxu0 }
 0x528   : > { %v1119_v5 = vadd.f32 %v1996_v4, %v1040_v3  ;;  %v1113_v6 = vpop.f32.mrb[3].mxu0  ;;  %v1349_v4 = vld [vmem:[#allocation3 + $0x118] sm:$0xff] }
 0x529   : > { %v1114_v7 = vadd.f32 %v1113_v6, %v1040_v3  ;;  %v1348_v3 = vld [vmem:[#allocation3 + $0x110] sm:$0xff] }
 0x52a   : > { %v1123_v8 = vadd.f32 %v1119_v5, %v757_v43  ;;  %v2136_v5 = vpack.c.bf16 %v1349_v4, %v1348_v3 }
 0x52b   : > { %v1122_v9 = vadd.f32 %v1114_v7, %v756_v37  ;;  %v2140_v37 = vpack.c.bf16 %v1440_v36, %v1439_v35 }
 0x52c   : > { %v1125_v12 = vmul.f32 %v1123_v8, %v2592_v56  ;;  %v1441_v8 = vld [vmem:[#allocation6 + $0x50] sm:$0xff] }
 0x52d   : > { %v1124_v10 = vmul.f32 %v1122_v9, %v2590_v49  ;;  %2141 = vmatprep.subr.bf16.mxu1 %v2140_v37  ;;  %v1442_v9 = vld [vmem:[#allocation6 + $0x58] sm:$0xff] }
 0x52e   : > { %v1129_v13 = vsel %vm329_vm0, %v1125_v12, 0.0  ;;  %2143 = vmatpush3.bf16.msra.mxu1 %v2140_v37 }
 0x52f   : > { %v1126_v11 = vsel %vm329_vm0, %v1124_v10, 0.0 }
 0x530   : > { %1127 = vadd.xlane.f32.xlu1 %v1126_v11  ;;  %v1811_v11 = vld [vmem:[%s2737_s4 + $0x8] sm:$0xf] }
 0x534   : > { %1130 = vadd.xlane.f32.xlu1 %v1129_v13 }
 0x5bd   : > { %v1128_v14 = vpop.xlane.xlu1 %1127 }
 0x5be   : > { %v1132_v15 = vmul.f32 0.03125, %v1128_v14 }
 0x5c0   : > { %v1134_v16 = vsub.f32 %v1124_v10, %v1132_v15  ;;  %v2144_v10 = vpack.c.bf16 %v1442_v9, %v1441_v8 }
 0x5c1   : > { %v1131_v17 = vpop.xlane.xlu1 %1130 }
 0x5c2   : > { %v1133_v18 = vmul.f32 0.03125, %v1131_v17  ;;  %v1136_v19 = vmul.f32 %v1134_v16, %v1134_v16  ;;  %2145 = vmatprep.subr.bf16.mxu1 %v2144_v10 }
 0x5c3   : > { %2147 = vmatpush3.bf16.msra.mxu1 %v2144_v10 }
 0x5c4   : > { %v1135_v20 = vsub.f32 %v1125_v12, %v1133_v18  ;;  %v1138_v21 = vsel %vm329_vm0, %v1136_v19, 0.0  ;;  %v1433_v12 = vrot.slane %v1811_v11, %v2574_v38  ;;  %v1446_v19 = vrot.slane %v1811_v11, %v2586_v47 }
 0x5c5   : > { %1139 = vadd.xlane.f32.xlu1 %v1138_v21 }
 0x5c6   : > { %v1137_v22 = vmul.f32 %v1135_v20, %v1135_v20 }
 0x5c8   : > { %v1141_v23 = vsel %vm329_vm0, %v1137_v22, 0.0 }
 0x5c9   : > { %1142 = vadd.xlane.f32.xlu1 %v1141_v23 }
 0x652   : > { %v1140_v40 = vpop.xlane.xlu1 %1139 }
 0x653   : > { %v1144_v41 = vmul.f32 0.03125, %v1140_v40 }
 0x655   : > { %v1146_v42 = vadd.f32 1e-05, %v1144_v41 }
 0x656   : > { %v1143_v43 = vpop.xlane.xlu1 %1142 }
 0x657   : > { %2239 = vrsqrt.f32 %v1146_v42  ;;  %v1145_v44 = vmul.f32 0.03125, %v1143_v43  ;;  %v1574_v42 = vld [vmem:[%s2738_s5] sm:$0xff]  ;;  %v1575_v43 = vld [vmem:[%s2738_s5 + $0x8] sm:$0xff] }
 0x659   : > { %v1147_v39 = vadd.f32 1e-05, %v1145_v44  ;;  %v2148_v44 = vpack.c.bf16 %v1575_v43, %v1574_v42 }
 0x65b   : > { %2241 = vrsqrt.f32 %v1147_v39  ;;  %v1576_v39 = vld [vmem:[%s2738_s5 + $0x10] sm:$0xff]  ;;  %2149 = vmatprep.subr.bf16.mxu1 %v2148_v44 }
 0x661   : > { %v2240_v46 = vpop.eup %2239 }
 0x662   : > { %v1150_v50 = vmul.f32 %v2240_v46, %v1134_v16 }
 0x664   : > { %v1156_v51 = vmul.f32 %v1155_v45, %v1150_v50 }
 0x665   : > { %v2242_v52 = vpop.eup %2241 }
 0x666   : > { %v1162_v53 = vadd.f32 %v1161_v48, %v1156_v51  ;;  %v1151_v54 = vmul.f32 %v2242_v52, %v1135_v20 }
 0x668   : > { %1164 = vst.msk [vmem:[#allocation2 + $0x8] sm:$0xff] %vm329_vm0, %v1162_v53  ;;  %v1157_v55 = vmul.f32 %v1155_v45, %v1151_v54  ;;  %v1577_v45 = vld [vmem:[%s2738_s5 + $0x18] sm:$0xff] }
 0x669   : > { %v2152_v46 = vpack.c.bf16 %v1577_v45, %v1576_v39 }
 0x66a   : > { %v1163_v57 = vadd.f32 %v1161_v48, %v1157_v55  ;;  %v1561_v55 = vrot.slane %v1811_v11, %v2601_v25 }
 0x66c   : > { %1165 = vst.msk [vmem:[#allocation2 + $0x10] sm:$0xff] %vm329_vm0, %v1163_v57 }
 0x66f   : > { %v1166_v58 = vld [vmem:[#allocation2 + $0x8] sm:$0xff] }
 0x670   : > { %2005 = vmatprep.mubr.msk.f32.mxu0 %vm329_vm0, %v1166_v58  ;;  %v1168_v1 = vld [vmem:[#allocation2 + $0x4] sm:$0xff] }
 0x673   : > { %v1167_v63 = vld [vmem:[#allocation2 + $0x10] sm:$0xff] }
 0x674   : > { %2006 = vmatmul.mubr.msk.f32.vlgmr.msra.gmra.mrb[4].mxu0 %vm329_vm0, %v1167_v63  ;;  %v1169_v6 = vld [vmem:[#allocation2 + $0xc] sm:$0xff]  ;;  %v1170_v7 = vld [vmem:[#allocation2 + $0x14] sm:$0xff] }
 0x675   : > { %2127 = vmatpush3.bf16.msra.mxu0 %v2124_v34  ;;  %2016 = vmatprep.mubr.msk.f32.mxu0 %vm329_vm0, %v1168_v1 }
 0x676   : > { %2129 = vmatprep.subr.bf16.mxu0 %v2128_v62 }
 0x679   : > { %2131 = vmatpush3.bf16.msra.mxu0 %v2128_v62 }
 0x67a   : > { %2133 = vmatprep.subr.bf16.mxu0 %v2132_v2 }
 0x67c   : > { %2017 = vmatmul.mubr.msk.f32.vlgmr.msra.gmra.mrb[4].mxu0 %vm329_vm0, %v1169_v6 }
 0x67d   : > { %2135 = vmatpush3.bf16.msra.mxu0 %v2132_v2  ;;  %2027 = vmatprep.mubr.msk.f32.mxu0 %vm329_vm0, %v1169_v6 }
 0x67e   : > { %2137 = vmatprep.subr.bf16.mxu0 %v2136_v5 }
 0x681   : > { %2139 = vmatpush3.bf16.msra.mxu0 %v2136_v5 }
 0x684   : > { %2028 = vmatmul.mubr.msk.f32.vlgmr.msra.gmra.mrb[4].mxu0 %vm329_vm0, %v1170_v7 }
 0x757   : > { %v2029_v13 = vpop.f32.mrb[4].mxu0 }
 0x758   : > { %v1435_v14 = vadd.f32 %v2029_v13, %v1433_v12  ;;  %v1419_v15 = vpop.f32.mrb[5].mxu0 }
 0x759   : > { %v1434_v16 = vadd.f32 %v1433_v12, %v1419_v15 }
 0x75a   : > { %v1437_v18 = vmax.f32 %v1435_v14, 0.0 }
 0x75b   : > { %v1436_v17 = vmax.f32 %v1434_v16, 0.0 }
 0x75d   : > { %2038 = vmatprep.mubr.msk.f32.mxu1 %vm329_vm0, %v1436_v17 }
 0x75e   : > { %2039 = vmatmul.mubr.msk.f32.vlgmr.msra.gmra.mrb[4].mxu1 %vm329_vm0, %v1437_v18 }
 0x75f   : > { %2151 = vmatpush3.bf16.msra.mxu1 %v2148_v44 }
 0x760   : > { %2153 = vmatprep.subr.bf16.mxu1 %v2152_v46 }
 0x763   : > { %2155 = vmatpush3.bf16.msra.mxu1 %v2152_v46 }
 0x831   : > { %v2040_v20 = vpop.f32.mrb[4].mxu1 }
 0x832   : > { %v1525_v21 = vadd.f32 %v2040_v20, %v1446_v19  ;;  %v1519_v22 = vpop.f32.mrb[5].mxu1 }
 0x833   : > { %v1520_v23 = vadd.f32 %v1519_v22, %v1446_v19 }
 0x834   : > { %v1529_v24 = vadd.f32 %v1525_v21, %v1167_v63 }
 0x835   : > { %v1528_v27 = vadd.f32 %v1520_v23, %v1166_v58  ;;  %v1567_v58 = vrot.slane %v1811_v11, %v2604_v26  ;;  %v1820_v26 = vld [vmem:[%s2739_s6] ss:$0 sm:$0xff] }
 0x836   : > { %v1531_v29 = vmul.f32 %v1529_v24, %v2592_v56 }
 0x837   : > { %v1530_v38 = vmul.f32 %v1528_v27, %v2590_v49 }
 0x838   : > { %v1535_v30 = vsel %vm329_vm0, %v1531_v29, 0.0 }
 0x839   : > { %v1532_v28 = vsel %vm329_vm0, %v1530_v38, 0.0 }
 0x83a   : > { %1533 = vadd.xlane.f32.xlu1 %v1532_v28 }
 0x83e   : > { %1536 = vadd.xlane.f32.xlu1 %v1535_v30 }
 0x8c7   : > { %v1534_v31 = vpop.xlane.xlu1 %1533 }
 0x8c8   : > { %v1538_v32 = vmul.f32 0.03125, %v1534_v31 }
 0x8ca   : > { %v1540_v33 = vsub.f32 %v1530_v38, %v1538_v32 }
 0x8cb   : > { %v1537_v47 = vpop.xlane.xlu1 %1536 }
 0x8cc   : > { %v1539_v34 = vmul.f32 0.03125, %v1537_v47  ;;  %v1542_v35 = vmul.f32 %v1540_v33, %v1540_v33 }
 0x8ce   : > { %v1541_v36 = vsub.f32 %v1531_v29, %v1539_v34  ;;  %v1544_v37 = vsel %vm329_vm0, %v1542_v35, 0.0 }
 0x8cf   : > { %1545 = vadd.xlane.f32.xlu1 %v1544_v37 }
 0x8d0   : > { %v1543_v40 = vmul.f32 %v1541_v36, %v1541_v36 }
 0x8d2   : > { %v1547_v41 = vsel %vm329_vm0, %v1543_v40, 0.0 }
 0x8d3   : > { %1548 = vadd.xlane.f32.xlu0 %v1547_v41 }
 0x95c   : > { %v1546_v48 = vpop.xlane.xlu1 %1545 }
 0x95d   : > { %v1550_v50 = vmul.f32 0.03125, %v1546_v48 }
 0x95f   : > { %v1552_v51 = vadd.f32 1e-05, %v1550_v50 }
 0x960   : > { %v1549_v52 = vpop.xlane.xlu0 %1548 }
 0x961   : > { %2243 = vrsqrt.f32 %v1552_v51  ;;  %v1551_v53 = vmul.f32 0.03125, %v1549_v52 }
 0x963   : > { %v1553_v54 = vadd.f32 1e-05, %v1551_v53 }
 0x965   : > { %2245 = vrsqrt.f32 %v1553_v54 }
 0x96b   : > { %v2244_v57 = vpop.eup %2243 }
 0x96c   : > { %v1556_v60 = vmul.f32 %v2244_v57, %v1540_v33 }
 0x96e   : > { %v1562_v61 = vmul.f32 %v1561_v55, %v1556_v60 }
 0x96f   : > { %v2246_v62 = vpop.eup %2245 }
 0x970   : > { %v1568_v63 = vadd.f32 %v1567_v58, %v1562_v61  ;;  %v1557_v0 = vmul.f32 %v2246_v62, %v1541_v36 }
 0x972   : > { %1570 = vst.msk [vmem:[#allocation2 + $0x8] sm:$0xff] %vm329_vm0, %v1568_v63  ;;  %v1563_v59 = vmul.f32 %v1561_v55, %v1557_v0 }
 0x974   : > { %v1569_v1 = vadd.f32 %v1567_v58, %v1563_v59 }
 0x976   : > { %1571 = vst.msk [vmem:[#allocation2 + $0x10] sm:$0xff] %vm329_vm0, %v1569_v1 }
 0x979   : > { %v1572_v2 = vld [vmem:[#allocation2 + $0x8] sm:$0xff] }
 0x97a   : > { %2049 = vmatprep.mubr.msk.f32.mxu1 %vm329_vm0, %v1572_v2 }
 0x97d   : > { %v1573_v25 = vld [vmem:[#allocation2 + $0x10] sm:$0xff] }
 0x97e   : > { %2050 = vmatmul.mubr.msk.f32.vlgmr.msra.gmra.mrb[6].mxu1 %vm329_vm0, %v1573_v25 }
 0xa51   : > { %v2051_v3 = vpop.f32.mrb[6].mxu1 }
 0xa52   : > { %v1663_v4 = vadd.f32 %v2051_v3, %v1820_v26  ;;  %v1657_v5 = vpop.f32.mrb[7].mxu1 }
 0xa53   : > { %v1658_v6 = vadd.f32 %v1820_v26, %v1657_v5 }
 0xa54   : > { %v1667_v7 = vmul.f32 %v1663_v4, %v2592_v56 }
 0xa55   : > { %v1666_v8 = vmul.f32 %v1658_v6, %v2590_v49 }
 0xa56   : > { %1670 = vst.msk [vmem:[%s316_s15 + $0x8] sm:$0xff] %vm1668_vm1, %v1667_v7 }
 0xa57   : > { %1669 = vst.msk [vmem:[%s316_s15] sm:$0xff] %vm1668_vm1, %v1666_v8 }
 0xa58   : > { %2316 = shalt.err (!%p2313_p11)
}
 0xa59   : > { %s2317_s21 = scalar_lea.hbm %s2687_s16, 256  ;;  %s2321_s29 = scalar_lea.hbm %s2740_s7, 512 }
 0xa5a   : > { %p2318_p13 = scmp.ne.s32.totalorder %s2687_s16, %s2317_s21  ;;  %p2322_p6 = scmp.lt.u32.totalorder %s2687_s16, %s2740_s7 }
 0xa5b   : > { %p2323_p9 = scmp.lt.u32.totalorder %s2321_s29, %s2317_s21  ;;  %p2325_p12 = scmp.lt.u32.totalorder %s2317_s21, %s2687_s16 }
 0xa5c   : > { %p2319_p5 = pnand %p2318_p13, %p2754_p1 }
 0xa5d   : > { %p2324_p10 = por %p2323_p9, %p2322_p6 }
 0xa5e   : > { %p2320_p0 = pneg %p2319_p5 }
 0xa5f   : > { %p2326_p2 = por %p2325_p12, %p2324_p10 }
 0xa61   : > { %p2327_p3 = pnand %p2326_p2, %p2320_p0 }
 0xa63   : > { %2330 = shalt.err (!%p2327_p3)
}
 0xa64   : > { %s2382_s15 = smov 128   ;;  %s2383_s19 = smov 8  }
 0xa65   : > { %2176 = dma.vmem_to_hbm [thread:$0]  (%p2754_p1), %s2689_s10, 256, %s2687_s16, %s2692_s28, %s2382_s15, %s2382_s15, %s2383_s19  }
 0xa66 PF: > { %p2193_p4 = scmp.ge.s32.totalorder %s2373_s27, 2  ;;  %s1700_s13 = sand.u32 1, %s2361_s24  }
 0xa67   : > { %p2755_p7 = scmp.ne.s32.totalorder %s2746_s12, 0  ;;  %s1701_s18 = scalar_lea.sflag [#allocation5], %s1700_s13 }
 0xa69   : > { %p2186_p8 = pnand %p2193_p4, %p2755_p7 }
 0xa6b   : > { %2356 = dma.done.wait (!%p2186_p8), %s1701_s18, 256  }
 0xa6c   : > { %2358 = vsyncadd (!%p2186_p8), %s1701_s18, 4294967040  ;;  %s2756_s14 = sld [smem:[#allocation12_spill]]  ;;  %p19_p11 = scmp.ge.s32.totalorder %s2449_s30, 4  }
 0xa6d   : > { %s2757_s24 = smov %s2365_s25  ;;  %s2758_s25 = smov %s2369_s26 }
 0xa6e   : > { %s2760_s27 = smov %s2449_s30  ;;  %21 = sbr.rel (!%p19_p11) target bundleno = 5 (0x5), region = 107 }
 0xa72   : > { %s2759_s26 = smov %s2756_s14 }
 0xa75   :  { %1706 = vsyncpa [#allocation4], 1 }
 0xa76   :  { %1708 = vsyncpa [#allocation4 + $0x1], 1 }
 0xa77   :  { %1709 = vsyncpa [#allocation7], 1 }
 0xa78   :  { %1710 = vsyncpa [#allocation5], 1 }
 0xa79   :  { %1712 = vsyncpa [#allocation5 + $0x1], 1 }

</bundles_post_ra>
